<compile_context>
chip_gen: v7x
topology: tpu7x:2x2x1
jax: 0.10.0
libtpu: 0.0.40
codegen_flags: <defaults>
</compile_context>

<pallas_src>
import functools

import numpy as np

import jax
import jax.numpy as jnp
from jax.experimental import pallas as pl
from jax.experimental.pallas import tpu as pltpu

EPS = 1e-5         # nn.InstanceNorm2d default eps (affine=False, biased var)
_MXU_MIN_K = 64    # pointwise stage uses the MXU when Cin >= this (sweep per gen)


def _inorm_relu(v, inv_n):
    """InstanceNorm (biased variance, no affine) + ReLU over the last axis.

    Two-pass (mean, then centred variance) in f32 for numerical parity with
    the framework reference; v is (rows, H*W) lane-dense so both reductions
    are single cross-lane XLU reduces.
    """
    mean = jnp.sum(v, axis=-1, keepdims=True) * inv_n
    c = v - mean
    var = jnp.sum(c * c, axis=-1, keepdims=True) * inv_n
    return jnp.maximum(c * jax.lax.rsqrt(var + EPS), 0.0)


def fused_dwsep_kernel(w_dw_ref, w_pw_ref, mask_ref, x_ref, o_ref, *,
                       H, W, KH, KW, use_mxu, mxu_dtype):
    # w_dw_ref : VMEM (KK, C, 1) f32    depthwise taps, broadcast over lanes
    # w_pw_ref : VMEM (C, Cout, 1) f32  [VPU path]  or  (Cout, C) mxu_dtype [MXU]
    # mask_ref : VMEM (KK, H*W) f32     0/1 halo masks per tap
    # x_ref    : VMEM (C, H*W)          lane-dense input slab for batch n
    # o_ref    : VMEM (Cout, H*W)       lane-dense output slab
    HW = H * W
    inv_hw = 1.0 / float(HW)
    ph, pw = KH // 2, KW // 2
    t_center = ph * KW + pw

    # pltpu.roll (XLU) needs a lane-aligned rolled axis; fall back otherwise.
    roll_fn = pltpu.roll if HW % 128 == 0 else jnp.roll

    x = x_ref[...].astype(jnp.float32)                       # (C, HW) f32

    # ---- stage 1: depthwise KxK conv (groups=C) on the flat slab ----------
    # centre tap: full mask, zero shift -> use it to initialise the accumulator
    acc = w_dw_ref[t_center] * x                             # (C,1)*(C,HW)
    for t in range(KH * KW):
        if t == t_center:
            continue
        dy, dx = divmod(t, KW)
        d = (dy - ph) * W + (dx - pw)                        # flat offset
        shifted = roll_fn(x, (-d) % HW, axis=1)              # XLU lane rotate
        masked = shifted * mask_ref[pl.ds(t, 1), :]          # zero the halo
        acc = acc + w_dw_ref[t] * masked
    y1 = _inorm_relu(acc, inv_hw)                            # (C, HW) f32

    # ---- stage 2: pointwise 1x1 conv ---------------------------------------
    if use_mxu:
        # lane-dense (C, HW) slab fed to the MXU; weights pre-cast in wrapper.
        z = jnp.dot(w_pw_ref[...], y1.astype(mxu_dtype),
                    preferred_element_type=jnp.float32)      # (Cout, HW)
    else:
        # VPU broadcast-MAC over Cin (small-K case; the MXU would be ~empty).
        C = y1.shape[0]
        z = w_pw_ref[0] * y1[0:1, :]                         # (Cout,1)*(1,HW)
        for c in range(1, C):
            z = z + w_pw_ref[c] * y1[c:c + 1, :]
    z = _inorm_relu(z, inv_hw)                               # (Cout, HW) f32

    o_ref[...] = z.astype(o_ref.dtype)                       # unmasked vst


def dw_separable_conv(x, dw_weight, pw_weight, kernel=3, *,
                      use_mxu=None, mxu_dtype=jnp.bfloat16):
    """x: (N,C,H,W); dw_weight: (C,1,KH,KW); pw_weight: (Cout,C,1,1)."""
    N, C, H, W = x.shape
    if isinstance(kernel, int):
        KH = KW = kernel
    else:
        KH, KW = kernel
    if KH % 2 != 1 or KW % 2 != 1:
        # PyTorch padding=k//2 changes the output size for even kernels.
        raise ValueError("only odd kernel sizes are supported")
    Cout = pw_weight.shape[0]
    ph, pw_ = KH // 2, KW // 2
    KK, HW = KH * KW, H * W

    if use_mxu is None:
        use_mxu = C >= _MXU_MIN_K

    # Lane-dense input / output layouts (metadata-only reshapes, no HBM pass).
    x_flat = x.reshape(N, C, HW)

    # Depthwise taps as (KK, C, 1): w_dw[t] broadcasts over (C, HW).
    w_dw = jnp.transpose(dw_weight.reshape(C, KK)).reshape(KK, C, 1)
    w_dw = w_dw.astype(jnp.float32)

    # Per-tap 0/1 halo masks, constant-folded at trace time (KK*HW*4 B).
    masks_np = np.zeros((KK, HW), np.float32)
    hh = np.arange(H)
    ww = np.arange(W)
    for t in range(KK):
        dy, dx = divmod(t, KW)
        oy, ox = dy - ph, dx - pw_
        mh = ((hh + oy >= 0) & (hh + oy < H)).astype(np.float32)
        mw = ((ww + ox >= 0) & (ww + ox < W)).astype(np.float32)
        masks_np[t] = np.outer(mh, mw).reshape(HW)
    masks = jnp.asarray(masks_np)

    if use_mxu:
        # Dense (Cout, C) slab, cast to the MXU dtype once here (not per step).
        w_pw = pw_weight.reshape(Cout, C).astype(mxu_dtype)
        w_pw_spec = pl.BlockSpec((Cout, C), lambda n: (0, 0))
    else:
        # (C, Cout, 1): w_pw[c] is a (Cout,1) column that broadcasts over lanes.
        w_pw = jnp.transpose(pw_weight.reshape(Cout, C)).reshape(C, Cout, 1)
        w_pw = w_pw.astype(jnp.float32)
        w_pw_spec = pl.BlockSpec((C, Cout, 1), lambda n: (0, 0, 0))

    kern = functools.partial(fused_dwsep_kernel, H=H, W=W, KH=KH, KW=KW,
                             use_mxu=use_mxu, mxu_dtype=mxu_dtype)

    y = pl.pallas_call(
        kern,
        out_shape=jax.ShapeDtypeStruct((N, Cout, HW), x.dtype),
        grid=(N,),
        in_specs=[
            pl.BlockSpec((KK, C, 1), lambda n: (0, 0, 0)),    # dw weights
            w_pw_spec,                                        # pw weights
            pl.BlockSpec((KK, HW), lambda n: (0, 0)),         # halo masks
            pl.BlockSpec((None, C, HW), lambda n: (n, 0, 0)), # input slab
        ],
        out_specs=pl.BlockSpec((None, Cout, HW), lambda n: (n, 0, 0)),
        compiler_params=pltpu.CompilerParams(
            dimension_semantics=("parallel",)),
    )(w_dw, w_pw, masks, x_flat)

    return y.reshape(N, Cout, H, W)   # metadata-only reshape


# ---------------------------------------------------------------------------
# Pure-JAX reference (same math as the PyTorch module) for correctness check
# ---------------------------------------------------------------------------
def _inorm_relu_ref(z):
    m = jnp.mean(z, axis=(-2, -1), keepdims=True)
    v = jnp.mean((z - m) ** 2, axis=(-2, -1), keepdims=True)
    return jnp.maximum((z - m) * jax.lax.rsqrt(v + EPS), 0.0)


def ref_forward(x, dw_weight, pw_weight, kernel=3):
    N, C, H, W = x.shape
    KH = KW = kernel
    p = KH // 2
    xpad = jnp.pad(x, ((0, 0), (0, 0), (p, p), (p, p)))
    acc = jnp.zeros((N, C, H, W), jnp.float32)
    for dy in range(KH):
        for dx in range(KW):
            acc = acc + dw_weight[:, 0, dy, dx][None, :, None, None] * \
                xpad[:, :, dy:dy + H, dx:dx + W]
    y1 = _inorm_relu_ref(acc)
    z = jnp.einsum("oi,nihw->nohw", pw_weight[:, :, 0, 0], y1)
    return _inorm_relu_ref(z)


if __name__ == "__main__":
    key = jax.random.PRNGKey(0)
    k_x, k_dw, k_pw = jax.random.split(key, 3)

    N, C_in, C_out, H, W, K = 2, 4, 8, 16, 16, 3

    x = jax.random.normal(k_x, (N, C_in, H, W), dtype=jnp.float32)
    dw_weight = 0.1 * jax.random.normal(k_dw, (C_in, 1, K, K), dtype=jnp.float32)
    pw_weight = 0.1 * jax.random.normal(k_pw, (C_out, C_in, 1, 1), dtype=jnp.float32)

    ref = ref_forward(x, dw_weight, pw_weight, kernel=K)

    # Default path: VPU broadcast-MAC pointwise stage (C_in < _MXU_MIN_K).
    fwd = jax.jit(functools.partial(dw_separable_conv, kernel=K))
    out = jax.block_until_ready(fwd(x, dw_weight, pw_weight))
    assert out.shape == (N, C_out, H, W)
    assert jnp.allclose(out, ref, atol=1e-3, rtol=1e-3), "VPU path mismatch"

    # Also exercise the MXU pointwise branch and its (Cout, H*W) store path
    # (f32 matmul here so the tolerance stays tight; bf16 is the default for
    # real channel counts).
    fwd_mxu = jax.jit(functools.partial(dw_separable_conv, kernel=K,
                                        use_mxu=True, mxu_dtype=jnp.float32))
    out_mxu = jax.block_until_ready(fwd_mxu(x, dw_weight, pw_weight))
    assert out_mxu.shape == (N, C_out, H, W)
    assert jnp.allclose(out_mxu, ref, atol=1e-3, rtol=1e-3), "MXU path mismatch"

    print("KERNEL_OK")
</pallas_src>

<mosaic_0001>
module attributes {stable_mosaic.version = 11 : i64} {
  func.func @fused_dwsep_kernel(%arg0: i32, %arg1: memref<9x4x1xf32, #tpu.memory_space<vmem>>, %arg2: memref<4x8x1xf32, #tpu.memory_space<vmem>>, %arg3: memref<9x256xf32, #tpu.memory_space<vmem>>, %arg4: memref<1x4x256xf32, #tpu.memory_space<vmem>>, %arg5: memref<1x8x256xf32, #tpu.memory_space<vmem>>) attributes {dimension_semantics = [#tpu.dimension_semantics<parallel>], iteration_bounds = array<i64: 2>, scalar_prefetch = 0 : i64, scratch_operands = 0 : i64, tpu.core_type = #tpu.core_type<tc>, window_params = [{pipeline_mode = #tpu.pipeline_mode<synchronous>, transform_indices = @transform_0, window_bounds = array<i64: 9, 4, 1>}, {pipeline_mode = #tpu.pipeline_mode<synchronous>, transform_indices = @transform_1, window_bounds = array<i64: 4, 8, 1>}, {pipeline_mode = #tpu.pipeline_mode<synchronous>, transform_indices = @transform_2, window_bounds = array<i64: 9, 256>}, {transform_indices = @transform_3, window_bounds = array<i64: 1, 4, 256>}, {transform_indices = @transform_4, window_bounds = array<i64: 1, 8, 256>}]} {
    %c0 = arith.constant 0 : index
    %c0_0 = arith.constant 0 : index
    %c0_1 = arith.constant 0 : index
    %0 = vector.load %arg4[%c0, %c0_0, %c0_1] : memref<1x4x256xf32, #tpu.memory_space<vmem>>, vector<1x4x256xf32>
    %1 = vector.shape_cast %0 : vector<1x4x256xf32> to vector<4x256xf32>
    %c4 = arith.constant 4 : index
    %c0_2 = arith.constant 0 : index
    %c0_3 = arith.constant 0 : index
    %2 = vector.load %arg1[%c4, %c0_2, %c0_3] : memref<9x4x1xf32, #tpu.memory_space<vmem>>, vector<1x4x1xf32>
    %3 = vector.shape_cast %2 : vector<1x4x1xf32> to vector<4x1xf32>
    %4 = vector.broadcast %3 : vector<4x1xf32> to vector<4x256xf32>
    %5 = arith.mulf %4, %1 : vector<4x256xf32>
    %c17_i32 = arith.constant 17 : i32
    %6 = tpu.dynamic_rotate %1 by %c17_i32 dim 1 : vector<4x256xf32>, i32 -> vector<4x256xf32>
    %c0_4 = arith.constant 0 : index
    %c0_5 = arith.constant 0 : index
    %7 = vector.load %arg3[%c0_4, %c0_5] : memref<9x256xf32, #tpu.memory_space<vmem>>, vector<1x256xf32>
    %8 = vector.broadcast %7 : vector<1x256xf32> to vector<4x256xf32>
    %9 = arith.mulf %6, %8 : vector<4x256xf32>
    %c0_6 = arith.constant 0 : index
    %c0_7 = arith.constant 0 : index
    %c0_8 = arith.constant 0 : index
    %10 = vector.load %arg1[%c0_6, %c0_7, %c0_8] : memref<9x4x1xf32, #tpu.memory_space<vmem>>, vector<1x4x1xf32>
    %11 = vector.shape_cast %10 : vector<1x4x1xf32> to vector<4x1xf32>
    %12 = vector.broadcast %11 : vector<4x1xf32> to vector<4x256xf32>
    %13 = arith.mulf %12, %9 : vector<4x256xf32>
    %14 = arith.addf %5, %13 : vector<4x256xf32>
    %c16_i32 = arith.constant 16 : i32
    %15 = tpu.dynamic_rotate %1 by %c16_i32 dim 1 : vector<4x256xf32>, i32 -> vector<4x256xf32>
    %c1 = arith.constant 1 : index
    %c0_9 = arith.constant 0 : index
    %16 = vector.load %arg3[%c1, %c0_9] : memref<9x256xf32, #tpu.memory_space<vmem>>, vector<1x256xf32>
    %17 = vector.broadcast %16 : vector<1x256xf32> to vector<4x256xf32>
    %18 = arith.mulf %15, %17 : vector<4x256xf32>
    %c1_10 = arith.constant 1 : index
    %c0_11 = arith.constant 0 : index
    %c0_12 = arith.constant 0 : index
    %19 = vector.load %arg1[%c1_10, %c0_11, %c0_12] : memref<9x4x1xf32, #tpu.memory_space<vmem>>, vector<1x4x1xf32>
    %20 = vector.shape_cast %19 : vector<1x4x1xf32> to vector<4x1xf32>
    %21 = vector.broadcast %20 : vector<4x1xf32> to vector<4x256xf32>
    %22 = arith.mulf %21, %18 : vector<4x256xf32>
    %23 = arith.addf %14, %22 : vector<4x256xf32>
    %c15_i32 = arith.constant 15 : i32
    %24 = tpu.dynamic_rotate %1 by %c15_i32 dim 1 : vector<4x256xf32>, i32 -> vector<4x256xf32>
    %c2 = arith.constant 2 : index
    %c0_13 = arith.constant 0 : index
    %25 = vector.load %arg3[%c2, %c0_13] : memref<9x256xf32, #tpu.memory_space<vmem>>, vector<1x256xf32>
    %26 = vector.broadcast %25 : vector<1x256xf32> to vector<4x256xf32>
    %27 = arith.mulf %24, %26 : vector<4x256xf32>
    %c2_14 = arith.constant 2 : index
    %c0_15 = arith.constant 0 : index
    %c0_16 = arith.constant 0 : index
    %28 = vector.load %arg1[%c2_14, %c0_15, %c0_16] : memref<9x4x1xf32, #tpu.memory_space<vmem>>, vector<1x4x1xf32>
    %29 = vector.shape_cast %28 : vector<1x4x1xf32> to vector<4x1xf32>
    %30 = vector.broadcast %29 : vector<4x1xf32> to vector<4x256xf32>
    %31 = arith.mulf %30, %27 : vector<4x256xf32>
    %32 = arith.addf %23, %31 : vector<4x256xf32>
    %c1_i32 = arith.constant 1 : i32
    %33 = tpu.dynamic_rotate %1 by %c1_i32 dim 1 : vector<4x256xf32>, i32 -> vector<4x256xf32>
    %c3 = arith.constant 3 : index
    %c0_17 = arith.constant 0 : index
    %34 = vector.load %arg3[%c3, %c0_17] : memref<9x256xf32, #tpu.memory_space<vmem>>, vector<1x256xf32>
    %35 = vector.broadcast %34 : vector<1x256xf32> to vector<4x256xf32>
    %36 = arith.mulf %33, %35 : vector<4x256xf32>
    %c3_18 = arith.constant 3 : index
    %c0_19 = arith.constant 0 : index
    %c0_20 = arith.constant 0 : index
    %37 = vector.load %arg1[%c3_18, %c0_19, %c0_20] : memref<9x4x1xf32, #tpu.memory_space<vmem>>, vector<1x4x1xf32>
    %38 = vector.shape_cast %37 : vector<1x4x1xf32> to vector<4x1xf32>
    %39 = vector.broadcast %38 : vector<4x1xf32> to vector<4x256xf32>
    %40 = arith.mulf %39, %36 : vector<4x256xf32>
    %41 = arith.addf %32, %40 : vector<4x256xf32>
    %c255_i32 = arith.constant 255 : i32
    %42 = tpu.dynamic_rotate %1 by %c255_i32 dim 1 : vector<4x256xf32>, i32 -> vector<4x256xf32>
    %c5 = arith.constant 5 : index
    %c0_21 = arith.constant 0 : index
    %43 = vector.load %arg3[%c5, %c0_21] : memref<9x256xf32, #tpu.memory_space<vmem>>, vector<1x256xf32>
    %44 = vector.broadcast %43 : vector<1x256xf32> to vector<4x256xf32>
    %45 = arith.mulf %42, %44 : vector<4x256xf32>
    %c5_22 = arith.constant 5 : index
    %c0_23 = arith.constant 0 : index
    %c0_24 = arith.constant 0 : index
    %46 = vector.load %arg1[%c5_22, %c0_23, %c0_24] : memref<9x4x1xf32, #tpu.memory_space<vmem>>, vector<1x4x1xf32>
    %47 = vector.shape_cast %46 : vector<1x4x1xf32> to vector<4x1xf32>
    %48 = vector.broadcast %47 : vector<4x1xf32> to vector<4x256xf32>
    %49 = arith.mulf %48, %45 : vector<4x256xf32>
    %50 = arith.addf %41, %49 : vector<4x256xf32>
    %c241_i32 = arith.constant 241 : i32
    %51 = tpu.dynamic_rotate %1 by %c241_i32 dim 1 : vector<4x256xf32>, i32 -> vector<4x256xf32>
    %c6 = arith.constant 6 : index
    %c0_25 = arith.constant 0 : index
    %52 = vector.load %arg3[%c6, %c0_25] : memref<9x256xf32, #tpu.memory_space<vmem>>, vector<1x256xf32>
    %53 = vector.broadcast %52 : vector<1x256xf32> to vector<4x256xf32>
    %54 = arith.mulf %51, %53 : vector<4x256xf32>
    %c6_26 = arith.constant 6 : index
    %c0_27 = arith.constant 0 : index
    %c0_28 = arith.constant 0 : index
    %55 = vector.load %arg1[%c6_26, %c0_27, %c0_28] : memref<9x4x1xf32, #tpu.memory_space<vmem>>, vector<1x4x1xf32>
    %56 = vector.shape_cast %55 : vector<1x4x1xf32> to vector<4x1xf32>
    %57 = vector.broadcast %56 : vector<4x1xf32> to vector<4x256xf32>
    %58 = arith.mulf %57, %54 : vector<4x256xf32>
    %59 = arith.addf %50, %58 : vector<4x256xf32>
    %c240_i32 = arith.constant 240 : i32
    %60 = tpu.dynamic_rotate %1 by %c240_i32 dim 1 : vector<4x256xf32>, i32 -> vector<4x256xf32>
    %c7 = arith.constant 7 : index
    %c0_29 = arith.constant 0 : index
    %61 = vector.load %arg3[%c7, %c0_29] : memref<9x256xf32, #tpu.memory_space<vmem>>, vector<1x256xf32>
    %62 = vector.broadcast %61 : vector<1x256xf32> to vector<4x256xf32>
    %63 = arith.mulf %60, %62 : vector<4x256xf32>
    %c7_30 = arith.constant 7 : index
    %c0_31 = arith.constant 0 : index
    %c0_32 = arith.constant 0 : index
    %64 = vector.load %arg1[%c7_30, %c0_31, %c0_32] : memref<9x4x1xf32, #tpu.memory_space<vmem>>, vector<1x4x1xf32>
    %65 = vector.shape_cast %64 : vector<1x4x1xf32> to vector<4x1xf32>
    %66 = vector.broadcast %65 : vector<4x1xf32> to vector<4x256xf32>
    %67 = arith.mulf %66, %63 : vector<4x256xf32>
    %68 = arith.addf %59, %67 : vector<4x256xf32>
    %c239_i32 = arith.constant 239 : i32
    %69 = tpu.dynamic_rotate %1 by %c239_i32 dim 1 : vector<4x256xf32>, i32 -> vector<4x256xf32>
    %c8 = arith.constant 8 : index
    %c0_33 = arith.constant 0 : index
    %70 = vector.load %arg3[%c8, %c0_33] : memref<9x256xf32, #tpu.memory_space<vmem>>, vector<1x256xf32>
    %71 = vector.broadcast %70 : vector<1x256xf32> to vector<4x256xf32>
    %72 = arith.mulf %69, %71 : vector<4x256xf32>
    %c8_34 = arith.constant 8 : index
    %c0_35 = arith.constant 0 : index
    %c0_36 = arith.constant 0 : index
    %73 = vector.load %arg1[%c8_34, %c0_35, %c0_36] : memref<9x4x1xf32, #tpu.memory_space<vmem>>, vector<1x4x1xf32>
    %74 = vector.shape_cast %73 : vector<1x4x1xf32> to vector<4x1xf32>
    %75 = vector.broadcast %74 : vector<4x1xf32> to vector<4x256xf32>
    %76 = arith.mulf %75, %72 : vector<4x256xf32>
    %77 = arith.addf %68, %76 : vector<4x256xf32>
    %cst = arith.constant dense<0.000000e+00> : vector<4xf32>
    %78 = vector.multi_reduction <add>, %77, %cst [1] : vector<4x256xf32> to vector<4xf32>
    %79 = vector.shape_cast %78 : vector<4xf32> to vector<4x1xf32>
    %cst_37 = arith.constant 3.906250e-03 : f32
    %80 = vector.broadcast %cst_37 : f32 to vector<4x1xf32>
    %81 = arith.mulf %79, %80 : vector<4x1xf32>
    %82 = vector.broadcast %81 : vector<4x1xf32> to vector<4x256xf32>
    %83 = arith.subf %77, %82 : vector<4x256xf32>
    %84 = arith.mulf %83, %83 : vector<4x256xf32>
    %cst_38 = arith.constant dense<0.000000e+00> : vector<4xf32>
    %85 = vector.multi_reduction <add>, %84, %cst_38 [1] : vector<4x256xf32> to vector<4xf32>
    %86 = vector.shape_cast %85 : vector<4xf32> to vector<4x1xf32>
    %cst_39 = arith.constant 3.906250e-03 : f32
    %87 = vector.broadcast %cst_39 : f32 to vector<4x1xf32>
    %88 = arith.mulf %86, %87 : vector<4x1xf32>
    %cst_40 = arith.constant 9.99999974E-6 : f32
    %89 = vector.broadcast %cst_40 : f32 to vector<4x1xf32>
    %90 = arith.addf %88, %89 : vector<4x1xf32>
    %91 = math.rsqrt %90 : vector<4x1xf32>
    %92 = vector.broadcast %91 : vector<4x1xf32> to vector<4x256xf32>
    %93 = arith.mulf %83, %92 : vector<4x256xf32>
    %cst_41 = arith.constant 0.000000e+00 : f32
    %94 = vector.broadcast %cst_41 : f32 to vector<4x256xf32>
    %95 = arith.maximumf %93, %94 : vector<4x256xf32>
    %c0_42 = arith.constant 0 : index
    %c0_43 = arith.constant 0 : index
    %c0_44 = arith.constant 0 : index
    %96 = vector.load %arg2[%c0_42, %c0_43, %c0_44] : memref<4x8x1xf32, #tpu.memory_space<vmem>>, vector<1x8x1xf32>
    %97 = vector.shape_cast %96 : vector<1x8x1xf32> to vector<8x1xf32>
    %98 = vector.extract_strided_slice %95 {offsets = [0, 0], sizes = [1, 256], strides = [1, 1]} : vector<4x256xf32> to vector<1x256xf32>
    %99 = vector.broadcast %97 : vector<8x1xf32> to vector<8x256xf32>
    %100 = vector.broadcast %98 : vector<1x256xf32> to vector<8x256xf32>
    %101 = arith.mulf %99, %100 : vector<8x256xf32>
    %c1_45 = arith.constant 1 : index
    %c0_46 = arith.constant 0 : index
    %c0_47 = arith.constant 0 : index
    %102 = vector.load %arg2[%c1_45, %c0_46, %c0_47] : memref<4x8x1xf32, #tpu.memory_space<vmem>>, vector<1x8x1xf32>
    %103 = vector.shape_cast %102 : vector<1x8x1xf32> to vector<8x1xf32>
    %104 = vector.extract_strided_slice %95 {offsets = [1, 0], sizes = [1, 256], strides = [1, 1]} : vector<4x256xf32> to vector<1x256xf32>
    %105 = vector.broadcast %103 : vector<8x1xf32> to vector<8x256xf32>
    %106 = vector.broadcast %104 : vector<1x256xf32> to vector<8x256xf32>
    %107 = arith.mulf %105, %106 : vector<8x256xf32>
    %108 = arith.addf %101, %107 : vector<8x256xf32>
    %c2_48 = arith.constant 2 : index
    %c0_49 = arith.constant 0 : index
    %c0_50 = arith.constant 0 : index
    %109 = vector.load %arg2[%c2_48, %c0_49, %c0_50] : memref<4x8x1xf32, #tpu.memory_space<vmem>>, vector<1x8x1xf32>
    %110 = vector.shape_cast %109 : vector<1x8x1xf32> to vector<8x1xf32>
    %111 = vector.extract_strided_slice %95 {offsets = [2, 0], sizes = [1, 256], strides = [1, 1]} : vector<4x256xf32> to vector<1x256xf32>
    %112 = vector.broadcast %110 : vector<8x1xf32> to vector<8x256xf32>
    %113 = vector.broadcast %111 : vector<1x256xf32> to vector<8x256xf32>
    %114 = arith.mulf %112, %113 : vector<8x256xf32>
    %115 = arith.addf %108, %114 : vector<8x256xf32>
    %c3_51 = arith.constant 3 : index
    %c0_52 = arith.constant 0 : index
    %c0_53 = arith.constant 0 : index
    %116 = vector.load %arg2[%c3_51, %c0_52, %c0_53] : memref<4x8x1xf32, #tpu.memory_space<vmem>>, vector<1x8x1xf32>
    %117 = vector.shape_cast %116 : vector<1x8x1xf32> to vector<8x1xf32>
    %118 = vector.extract_strided_slice %95 {offsets = [3, 0], sizes = [1, 256], strides = [1, 1]} : vector<4x256xf32> to vector<1x256xf32>
    %119 = vector.broadcast %117 : vector<8x1xf32> to vector<8x256xf32>
    %120 = vector.broadcast %118 : vector<1x256xf32> to vector<8x256xf32>
    %121 = arith.mulf %119, %120 : vector<8x256xf32>
    %122 = arith.addf %115, %121 : vector<8x256xf32>
    %cst_54 = arith.constant dense<0.000000e+00> : vector<8xf32>
    %123 = vector.multi_reduction <add>, %122, %cst_54 [1] : vector<8x256xf32> to vector<8xf32>
    %124 = vector.shape_cast %123 : vector<8xf32> to vector<8x1xf32>
    %cst_55 = arith.constant 3.906250e-03 : f32
    %125 = vector.broadcast %cst_55 : f32 to vector<8x1xf32>
    %126 = arith.mulf %124, %125 : vector<8x1xf32>
    %127 = vector.broadcast %126 : vector<8x1xf32> to vector<8x256xf32>
    %128 = arith.subf %122, %127 : vector<8x256xf32>
    %129 = arith.mulf %128, %128 : vector<8x256xf32>
    %cst_56 = arith.constant dense<0.000000e+00> : vector<8xf32>
    %130 = vector.multi_reduction <add>, %129, %cst_56 [1] : vector<8x256xf32> to vector<8xf32>
    %131 = vector.shape_cast %130 : vector<8xf32> to vector<8x1xf32>
    %cst_57 = arith.constant 3.906250e-03 : f32
    %132 = vector.broadcast %cst_57 : f32 to vector<8x1xf32>
    %133 = arith.mulf %131, %132 : vector<8x1xf32>
    %cst_58 = arith.constant 9.99999974E-6 : f32
    %134 = vector.broadcast %cst_58 : f32 to vector<8x1xf32>
    %135 = arith.addf %133, %134 : vector<8x1xf32>
    %136 = math.rsqrt %135 : vector<8x1xf32>
    %137 = vector.broadcast %136 : vector<8x1xf32> to vector<8x256xf32>
    %138 = arith.mulf %128, %137 : vector<8x256xf32>
    %cst_59 = arith.constant 0.000000e+00 : f32
    %139 = vector.broadcast %cst_59 : f32 to vector<8x256xf32>
    %140 = arith.maximumf %138, %139 : vector<8x256xf32>
    %c0_60 = arith.constant 0 : index
    %c0_61 = arith.constant 0 : index
    %c0_62 = arith.constant 0 : index
    %141 = vector.load %arg5[%c0_60, %c0_61, %c0_62] : memref<1x8x256xf32, #tpu.memory_space<vmem>>, vector<1x8x256xf32>
    %142 = vector.shape_cast %141 : vector<1x8x256xf32> to vector<8x256xf32>
    %143 = vector.shape_cast %140 : vector<8x256xf32> to vector<1x8x256xf32>
    tpu.vector_store %arg5[%c0_60, %c0_61, %c0_62], %143 {strides = array<i32>} : memref<1x8x256xf32, #tpu.memory_space<vmem>>, vector<1x8x256xf32>,
    return
  }
  func.func @transform_0(%arg0: i32) -> (i32, i32, i32) {
    %c0_i32 = arith.constant 0 : i32
    %c0_i32_0 = arith.constant 0 : i32
    %c0_i32_1 = arith.constant 0 : i32
    %c0_i32_2 = arith.constant 0 : i32
    return %c0_i32, %c0_i32_0, %c0_i32_1 : i32, i32, i32
  }
  func.func @transform_1(%arg0: i32) -> (i32, i32, i32) {
    %c0_i32 = arith.constant 0 : i32
    %c0_i32_0 = arith.constant 0 : i32
    %c0_i32_1 = arith.constant 0 : i32
    %c0_i32_2 = arith.constant 0 : i32
    return %c0_i32, %c0_i32_0, %c0_i32_1 : i32, i32, i32
  }
  func.func @transform_2(%arg0: i32) -> (i32, i32) {
    %c0_i32 = arith.constant 0 : i32
    %c0_i32_0 = arith.constant 0 : i32
    %c0_i32_1 = arith.constant 0 : i32
    return %c0_i32, %c0_i32_0 : i32, i32
  }
  func.func @transform_3(%arg0: i32) -> (i32, i32, i32) {
    %c0_i32 = arith.constant 0 : i32
    %c0_i32_0 = arith.constant 0 : i32
    %c0_i32_1 = arith.constant 0 : i32
    return %arg0, %c0_i32, %c0_i32_0 : i32, i32, i32
  }
  func.func @transform_4(%arg0: i32) -> (i32, i32, i32) {
    %c0_i32 = arith.constant 0 : i32
    %c0_i32_0 = arith.constant 0 : i32
    %c0_i32_1 = arith.constant 0 : i32
    return %arg0, %c0_i32, %c0_i32_0 : i32, i32, i32
  }
}

</mosaic_0001>

<bundles_post_ra>
// kernel: dw_separable_conv.1
= control target key start
LH: loop header
LB: loop body
LE: loop exit
PB: predicated region body
PF: predicated region fallthrough
CT: control target
= control target key end

     0   :  { %s743_s15 = smov 0   ;;  %s935_s0 = inlined_call_operand.vmem [shape: f32[9,4,1], index: 0, kind: input, shape index: {}]   ;;  %s936_s1 = inlined_call_operand.vmem [shape: f32[4,8,1], index: 1, kind: input, shape index: {}]   ;;  %s937_s2 = inlined_call_operand.vmem [shape: f32[9,256], index: 2, kind: input, shape index: {}]   ;;  %s938_s3 = inlined_call_operand.vmem [shape: f32[2,4,256], index: 3, kind: input, shape index: {}]   ;;  %s939_s4 = inlined_call_operand.vmem [shape: f32[2,8,256], index: 4, kind: output, shape index: {}]  }
   0x1 LB: > { %s646_s16 = sadd.s32 4294967295, %s707_s15   ;;  %p650_p0 = scmp.ge.s32.totalorder %s707_s15, 1  ;;  %s707_s15 = sphi %s743_s15, %s14_s15  }
   0x2   : > { %p162_p1 = scmp.lt.s32.totalorder %s707_s15, 3 }
   0x4   : > { %p163_p2 = pnand %p650_p0, %p162_p1 }
   0x5   : > { %v657_v0 = vld [vmem:[%s935_s0 + $0x4] sm:$0xf] (!%p163_p2)  ;;  %v655_v1 = vld [vmem:[%s935_s0 + $0x10] sm:$0xf] (!%p163_p2)  ;;  %p188_p3 = scmp.lt.s32.totalorder (!%p163_p2), %s646_s16, 1  ;;  %v709_v2 = vmov (!%p163_p2), 0   ;;  %v215_v20 = vlaneseq (!%p163_p2) }
   0x6   : > { %166 = sbr.rel (%p163_p2) target bundleno = 833 (0x341), region = 36  ;;  %695 = vset.pattern.permute.xlu1 (!%p163_p2), %v709_v2  ;;  %694 = vset.pattern.permute.xlu0 (!%p163_p2), %v709_v2  ;;  %v234_v3 = vld [vmem:[%s935_s0] sm:$0xf] (!%p163_p2)  ;;  %s710_s27 = smov (!%p163_p2), 17   ;;  %v659_v6 = vld [vmem:[%s935_s0 + $0x8] sm:$0xf] (!%p163_p2) }
   0x7   : > { %270 = vperm.xlu1 (!%p163_p2), %695, %v657_v0   ;;  %203 = vperm.xlu0 (!%p163_p2), %694, %v655_v1   ;;  %s711_s30 = smov (!%p163_p2), 16   ;;  %v661_v7 = vld [vmem:[%s935_s0 + $0xc] sm:$0xf] (!%p163_p2)  ;;  %s712_s7 = smov (!%p163_p2), 15   ;;  %v663_v8 = vld [vmem:[%s935_s0 + $0x14] sm:$0xf] (!%p163_p2) }
   0x8   : > { %s713_s10 = smov (!%p163_p2), 1   ;;  %v665_v9 = vld [vmem:[%s935_s0 + $0x18] sm:$0xf] (!%p163_p2)  ;;  %s714_s13 = smov (!%p163_p2), 127   ;;  %v667_v10 = vld [vmem:[%s935_s0 + $0x1c] sm:$0xf] (!%p163_p2) }
   0x9   : > { %s715_s18 = smov (!%p163_p2), 113   ;;  %v669_v11 = vld [vmem:[%s935_s0 + $0x20] sm:$0xf] (!%p163_p2)  ;;  %s716_s21 = smov (!%p163_p2), 112   ;;  %v812_v23 = vshrl.u32 (!%p163_p2), %v215_v20, 7  ;;  %v814_v24 = vand.u32 (!%p163_p2), 127, %v215_v20 }
   0xa   : > { %s717_s22 = smov (!%p163_p2), 111   ;;  %v220_v29 = vld [vmem:[%s937_s2] ss:$8 sm:$0x3] (!%p163_p2)  ;;  %vm475_vm8 = vcmask (!%p163_p2), 1043456  }
   0xb   : > { %237 = vperm.xlu0 (!%p163_p2), %694, %v234_v3   ;;  %v819_v27 = vsub.s32 (!%p163_p2), 0, %v812_v23  ;;  %v822_v28 = vsub.s32 (!%p163_p2), 1, %v812_v23  ;;  %vm217_vm0 = vcmp.lt.s32.totalorder (!%p163_p2), %v814_v24, 17  ;;  %v656_v31 = vld [vmem:[%s937_s2 + $0x1] ss:$8 sm:$0x3] (!%p163_p2) }
   0xc   : > { %vm248_vm1 = vcmp.lt.s32.totalorder (!%p163_p2), %v814_v24, 16  ;;  %v658_v39 = vld [vmem:[%s937_s2 + $0x2] ss:$8 sm:$0x3] (!%p163_p2)  ;;  %vm281_vm2 = vcmp.lt.s32.totalorder (!%p163_p2), %v814_v24, 15  ;;  %vm314_vm3 = vcmp.lt.s32.totalorder (!%p163_p2), %v814_v24, 1 }
   0xd   : > { %s941_s16 = smov (!%p188_p3, %s646_s16), 1  ;;  %v225_v33 = vrot.slane %v220_v29, %v819_v27  ;;  %v229_v34 = vrot.slane %v220_v29, %v822_v28  ;;  %v257_v37 = vrot.slane %v656_v31, %v819_v27  ;;  %v261_v38 = vrot.slane %v656_v31, %v822_v28  ;;  %v660_v46 = vld [vmem:[%s937_s2 + $0x3] ss:$8 sm:$0x3] }
   0xe   : > { %s675_s23 = sshll.u32 %s941_s16, 3  ;;  %v662_v47 = vld [vmem:[%s937_s2 + $0x5] ss:$8 sm:$0x3]  ;;  %v290_v48 = vrot.slane %v658_v39, %v819_v27  ;;  %v294_v49 = vrot.slane %v658_v39, %v822_v28  ;;  %v323_v55 = vrot.slane %v660_v46, %v819_v27  ;;  %v327_v56 = vrot.slane %v660_v46, %v822_v28 }
   0xf   : > { %s192_s26 = scalar_lea.vmem %s938_s3, %s675_s23  ;;  %vm347_vm4 = vcmp.lt.s32.totalorder %v814_v24, 127  ;;  %v356_v57 = vrot.slane %v662_v47, %v819_v27  ;;  %v360_v1 = vrot.slane %v662_v47, %v822_v28  ;;  %vm380_vm5 = vcmp.lt.s32.totalorder %v814_v24, 113  ;;  %v664_v2 = vld [vmem:[%s937_s2 + $0x6] ss:$8 sm:$0x3]  ;;  %s676_s23 = sshll.u32 %s941_s16, 4 }
  0x10   : > { %v766_v4 = vld [vmem:[%s192_s26] sm:$0xff]  ;;  %vm413_vm6 = vcmp.lt.s32.totalorder %v814_v24, 112  ;;  %vm446_vm7 = vcmp.lt.s32.totalorder %v814_v24, 111  ;;  %v670_v24 = vld [vmem:[%s936_s1 + $0x8] sm:$0xff]  ;;  %s197_s26 = scalar_lea.vmem %s939_s4, %s676_s23 }
  0x11   : > { %211 = vrot.lane.b32.xlu1 %v766_v4, %s710_s27  ;;  %v771_v5 = vcombine.high %v766_v4, %v766_v4 }
  0x13   : > { %213 = vrot.lane.b32.xlu0 %v771_v5, %s710_s27 }
  0x15   : > { %303 = vperm.xlu1 %695, %v659_v6  }
  0x17   : > { %244 = vrot.lane.b32.xlu0 %v766_v4, %s711_s30 }
  0x19   : > { %246 = vrot.lane.b32.xlu1 %v771_v5, %s711_s30 }
  0x1b   : > { %336 = vperm.xlu0 %694, %v661_v7  }
  0x1d   : > { %277 = vrot.lane.b32.xlu1 %v766_v4, %s712_s7 }
  0x1f   : > { %279 = vrot.lane.b32.xlu0 %v771_v5, %s712_s7 }
  0x21   : > { %369 = vperm.xlu1 %695, %v663_v8  }
  0x23   : > { %310 = vrot.lane.b32.xlu0 %v766_v4, %s713_s10 }
  0x25   : > { %312 = vrot.lane.b32.xlu1 %v771_v5, %s713_s10 }
  0x27   : > { %402 = vperm.xlu0 %694, %v665_v9  }
  0x29   : > { %343 = vrot.lane.b32.xlu1 %v766_v4, %s714_s13 }
  0x2b   : > { %345 = vrot.lane.b32.xlu0 %v771_v5, %s714_s13 }
  0x2d   : > { %435 = vperm.xlu1 %695, %v667_v10  }
  0x2f   : > { %376 = vrot.lane.b32.xlu0 %v766_v4, %s715_s18 }
  0x31   : > { %378 = vrot.lane.b32.xlu1 %v771_v5, %s715_s18 }
  0x33   : > { %468 = vperm.xlu0 %694, %v669_v11  }
  0x35   : > { %409 = vrot.lane.b32.xlu1 %v766_v4, %s716_s21 }
  0x37   : > { %411 = vrot.lane.b32.xlu0 %v771_v5, %s716_s21 }
  0x39   : > { %442 = vrot.lane.b32.xlu1 %v766_v4, %s717_s22 }
  0x3b   : > { %444 = vrot.lane.b32.xlu0 %v771_v5, %s717_s22 }
  0x86   : > { %v806_v12 = vpop.permute.xlu1 %270  ;;  %v204_v13 = vpop.permute.xlu0 %203 }
  0x87   : > { %v209_v3 = vmul.f32 %v204_v13, %v766_v4  ;;  %v210_v6 = vmul.f32 %v771_v5, %v204_v13  ;;  %v389_v4 = vrot.slane %v664_v2, %v819_v27  ;;  %v393_v5 = vrot.slane %v664_v2, %v822_v28 }
  0x8a   : > { %v238_v14 = vpop.permute.xlu0 %237  ;;  %v212_v15 = vpop.permute.xlu1 %211 }
  0x8e   : > { %v214_v16 = vpop.permute.xlu0 %213 }
  0x8f   : > { %v218_v35 = vsel %vm217_vm0, %v212_v15, %v214_v16  ;;  %v219_v36 = vsel %vm217_vm0, %v214_v16, %v212_v15 }
  0x90   : > { %v232_v44 = vmul.f32 %v225_v33, %v219_v36  ;;  %v233_v45 = vmul.f32 %v229_v34, %v218_v35  ;;  %v668_v36 = vld [vmem:[%s937_s2 + $0x10] ss:$8 sm:$0x3] }
  0x91   : > { %v455_v46 = vrot.slane %v668_v36, %v819_v27  ;;  %v459_v47 = vrot.slane %v668_v36, %v822_v28  ;;  %v561_v36 = vsub.s32 3, %v812_v23 }
  0x92   : > { %v245_v18 = vpop.permute.xlu0 %244  ;;  %v240_v59 = vmul.f32 %v238_v14, %v232_v44  ;;  %v241_v60 = vmul.f32 %v238_v14, %v233_v45 }
  0x94   : > { %v808_v17 = vpop.permute.xlu1 %303 }
  0x98   : > { %v247_v19 = vpop.permute.xlu1 %246 }
  0x99   : > { %v249_v41 = vsel %vm248_vm1, %v245_v18, %v247_v19  ;;  %v250_v42 = vsel %vm248_vm1, %v247_v19, %v245_v18  ;;  %v242_v18 = vadd.f32 %v240_v59, %v209_v3  ;;  %v243_v19 = vadd.f32 %v241_v60, %v210_v6 }
  0x9a   : > { %v810_v21 = vpop.permute.xlu0 %336  ;;  %v264_v50 = vmul.f32 %v257_v37, %v250_v42  ;;  %v265_v51 = vmul.f32 %v261_v38, %v249_v41 }
  0x9c   : > { %v278_v22 = vpop.permute.xlu1 %277  ;;  %v273_v7 = vmul.f32 %v806_v12, %v264_v50  ;;  %v274_v8 = vmul.f32 %v806_v12, %v265_v51 }
  0x9e   : > { %v280_v25 = vpop.permute.xlu0 %279  ;;  %v276_v33 = vadd.f32 %v274_v8, %v243_v19 }
  0x9f   : > { %v282_v52 = vsel %vm281_vm2, %v278_v22, %v280_v25  ;;  %v283_v53 = vsel %vm281_vm2, %v280_v25, %v278_v22  ;;  %v666_v25 = vld [vmem:[%s937_s2 + $0x7] ss:$8 sm:$0x3] }
  0xa0   : > { %v816_v26 = vpop.permute.xlu1 %369  ;;  %v297_v63 = vmul.f32 %v290_v48, %v283_v53  ;;  %v298_v0 = vmul.f32 %v294_v49, %v282_v52  ;;  %v422_v39 = vrot.slane %v666_v25, %v819_v27  ;;  %v426_v41 = vrot.slane %v666_v25, %v822_v28  ;;  %v498_v25 = vld [vmem:[%s936_s1] sm:$0xff] }
  0xa2   : > { %v311_v30 = vpop.permute.xlu0 %310  ;;  %v306_v13 = vmul.f32 %v808_v17, %v297_v63  ;;  %v307_v12 = vmul.f32 %v808_v17, %v298_v0 }
  0xa4   : > { %v313_v32 = vpop.permute.xlu1 %312 }
  0xa5   : > { %v315_v61 = vsel %vm314_vm3, %v311_v30, %v313_v32  ;;  %v316_v62 = vsel %vm314_vm3, %v313_v32, %v311_v30  ;;  %v275_v32 = vadd.f32 %v273_v7, %v242_v18 }
  0xa6   : > { %v839_v40 = vpop.permute.xlu0 %402  ;;  %v330_v10 = vmul.f32 %v323_v55, %v316_v62  ;;  %v331_v11 = vmul.f32 %v327_v56, %v315_v61 }
  0xa7   : > { %v308_v42 = vadd.f32 %v306_v13, %v275_v32 }
  0xa8   : > { %v344_v43 = vpop.permute.xlu1 %343  ;;  %v339_v34 = vmul.f32 %v810_v21, %v330_v10  ;;  %v340_v17 = vmul.f32 %v810_v21, %v331_v11 }
  0xaa   : > { %v346_v54 = vpop.permute.xlu0 %345  ;;  %v341_v48 = vadd.f32 %v339_v34, %v308_v42 }
  0xab   : > { %v348_v14 = vsel %vm347_vm4, %v344_v43, %v346_v54  ;;  %v349_v15 = vsel %vm347_vm4, %v346_v54, %v344_v43  ;;  %v309_v43 = vadd.f32 %v307_v12, %v276_v33 }
  0xac   : > { %v855_v58 = vpop.permute.xlu1 %435  ;;  %v363_v29 = vmul.f32 %v356_v57, %v348_v14  ;;  %v364_v30 = vmul.f32 %v360_v1, %v349_v15  ;;  %v671_v15 = vld [vmem:[%s936_s1 + $0x10] sm:$0xff] }
  0xad   : > { %v342_v49 = vadd.f32 %v340_v17, %v309_v43 }
  0xae   : > { %v377_v9 = vpop.permute.xlu0 %376  ;;  %v372_v44 = vmul.f32 %v816_v26, %v363_v29  ;;  %v373_v45 = vmul.f32 %v816_v26, %v364_v30  ;;  %v672_v29 = vld [vmem:[%s936_s1 + $0x18] sm:$0xff] }
  0xb0   : > { %v379_v16 = vpop.permute.xlu1 %378  ;;  %v374_v56 = vadd.f32 %v372_v44, %v341_v48  ;;  %v375_v57 = vadd.f32 %v373_v45, %v342_v49 }
  0xb1   : > { %v381_v20 = vsel %vm380_vm5, %v377_v9, %v379_v16  ;;  %v382_v22 = vsel %vm380_vm5, %v379_v16, %v377_v9 }
  0xb2   : > { %v469_v31 = vpop.permute.xlu0 %468  ;;  %v396_v37 = vmul.f32 %v389_v4, %v381_v20  ;;  %v397_v38 = vmul.f32 %v393_v5, %v382_v22 }
  0xb4   : > { %v410_v35 = vpop.permute.xlu1 %409  ;;  %v405_v52 = vmul.f32 %v839_v40, %v396_v37  ;;  %v406_v53 = vmul.f32 %v839_v40, %v397_v38  ;;  %v542_v37 = vsub.s32 2, %v812_v23 }
  0xb6   : > { %v412_v21 = vpop.permute.xlu0 %411  ;;  %v407_v0 = vadd.f32 %v405_v52, %v374_v56  ;;  %v408_v1 = vadd.f32 %v406_v53, %v375_v57 }
  0xb7   : > { %v414_v50 = vsel %vm413_vm6, %v410_v35, %v412_v21  ;;  %v415_v51 = vsel %vm413_vm6, %v412_v21, %v410_v35 }
  0xb8   : > { %v429_v54 = vmul.f32 %v422_v39, %v414_v50  ;;  %v430_v55 = vmul.f32 %v426_v41, %v415_v51  ;;  %v443_v26 = vpop.permute.xlu1 %442 }
  0xba   : > { %v438_v59 = vmul.f32 %v855_v58, %v429_v54  ;;  %v439_v60 = vmul.f32 %v855_v58, %v430_v55  ;;  %v445_v61 = vpop.permute.xlu0 %444 }
  0xbb   : > { %v447_v62 = vsel %vm446_vm7, %v443_v26, %v445_v61  ;;  %v448_v63 = vsel %vm446_vm7, %v445_v61, %v443_v26 }
  0xbc   : > { %v462_v2 = vmul.f32 %v455_v46, %v447_v62  ;;  %v463_v40 = vmul.f32 %v459_v47, %v448_v63  ;;  %v440_v7 = vadd.f32 %v438_v59, %v407_v0  ;;  %v441_v8 = vadd.f32 %v439_v60, %v408_v1 }
  0xbe   : > { %v471_v3 = vmul.f32 %v469_v31, %v462_v2  ;;  %v472_v6 = vmul.f32 %v469_v31, %v463_v40 }
  0xc0   : > { %v473_v9 = vadd.f32 %v471_v3, %v440_v7  ;;  %v474_v10 = vadd.f32 %v472_v6, %v441_v8 }
  0xc2   : > { %v476_v58 = vsel %vm475_vm8, %v473_v9, 0.0  ;;  %v477_v11 = vsel %vm475_vm8, %v474_v10, 0.0 }
  0xc3   : > { %v478_v14 = vadd.f32 %v477_v11, %v476_v58 }
  0xc5   : > { %479 = vadd.xlane.f32.xlu1 %v478_v14 }
  0xd6   : > { %518 = vperm.xlu1 %695, %v670_v24  }
  0xda   : > { %537 = vperm.xlu1 %695, %v671_v15  }
 0x152   : > { %v480_v16 = vpop.xlane.xlu1 %479 }
 0x153   : > { %v481_v18 = vmul.f32 0.00390625, %v480_v16 }
 0x155   : > { %v482_v19 = vsub.f32 %v473_v9, %v481_v18  ;;  %v483_v4 = vsub.f32 %v474_v10, %v481_v18 }
 0x156   : > { %v519_v35 = vpop.permute.xlu1 %518 }
 0x157   : > { %v484_v5 = vmul.f32 %v482_v19, %v482_v19  ;;  %v485_v13 = vmul.f32 %v483_v4, %v483_v4 }
 0x159   : > { %v486_v12 = vsel %vm475_vm8, %v484_v5, 0.0  ;;  %v487_v20 = vsel %vm475_vm8, %v485_v13, 0.0 }
 0x15a   : > { %v488_v22 = vadd.f32 %v487_v20, %v486_v12  ;;  %v538_v23 = vpop.permute.xlu1 %537 }
 0x15c   : > { %489 = vadd.xlane.f32.xlu0 %v488_v22 }
 0x172   : > { %501 = vperm.xlu0 %694, %v498_v25  }
 0x176   : > { %556 = vperm.xlu0 %694, %v672_v29  }
 0x1e9   : > { %v490_v30 = vpop.xlane.xlu0 %489 }
 0x1ea   : > { %v491_v31 = vmul.f32 0.00390625, %v490_v30 }
 0x1ec   : > { %v492_v32 = vadd.f32 1e-05, %v491_v31 }
 0x1ee   : > { %697 = vrsqrt.f32 %v492_v32 }
 0x1f1   : > { %v502_v41 = vpop.permute.xlu0 %501 }
 0x1f5   : > { %v557_v56 = vpop.permute.xlu0 %556 }
 0x1f8   : > { %v698_v33 = vpop.eup %697 }
 0x1f9   : > { %v494_v34 = vmul.f32 %v698_v33, %v482_v19  ;;  %v495_v17 = vmul.f32 %v698_v33, %v483_v4 }
 0x1fb   : > { %v496_v38 = vmax.f32 %v494_v34, 0.0  ;;  %v497_v39 = vmax.f32 %v495_v17, 0.0 }
 0x1fd   : > { %v507_v42 = vrot.slane %v496_v38, %v819_v27  ;;  %v511_v43 = vrot.slane %v497_v39, %v819_v27  ;;  %v524_v44 = vrot.slane %v496_v38, %v822_v28  ;;  %v528_v45 = vrot.slane %v497_v39, %v822_v28 }
 0x1fe   : > { %v562_v21 = vrot.slane %v496_v38, %v561_v36  ;;  %v566_v46 = vrot.slane %v497_v39, %v561_v36  ;;  %v543_v47 = vrot.slane %v496_v38, %v542_v37  ;;  %v547_v48 = vrot.slane %v497_v39, %v542_v37 }
 0x1ff   : > { %v512_v49 = vmul.f32 %v507_v42, %v502_v41  ;;  %v513_v50 = vmul.f32 %v511_v43, %v502_v41  ;;  %v529_v51 = vmul.f32 %v524_v44, %v519_v35  ;;  %v530_v52 = vmul.f32 %v528_v45, %v519_v35 }
 0x200   : > { %v548_v55 = vmul.f32 %v543_v47, %v538_v23  ;;  %v549_v26 = vmul.f32 %v547_v48, %v538_v23  ;;  %v567_v57 = vmul.f32 %v562_v21, %v557_v56  ;;  %v568_v27 = vmul.f32 %v566_v46, %v557_v56 }
 0x201   : > { %v531_v53 = vadd.f32 %v529_v51, %v512_v49  ;;  %v532_v54 = vadd.f32 %v530_v52, %v513_v50 }
 0x203   : > { %v550_v59 = vadd.f32 %v548_v55, %v531_v53  ;;  %v551_v60 = vadd.f32 %v549_v26, %v532_v54 }
 0x205   : > { %v569_v61 = vadd.f32 %v567_v57, %v550_v59  ;;  %v570_v28 = vadd.f32 %v568_v27, %v551_v60 }
 0x207   : > { %v571_v62 = vadd.f32 %v570_v28, %v569_v61 }
 0x209   : > { %572 = vadd.xlane.f32.xlu1 %v571_v62 }
 0x296   : > { %v573_v63 = vpop.xlane.xlu1 %572 }
 0x297   : > { %v574_v0 = vmul.f32 0.00390625, %v573_v63 }
 0x299   : > { %v575_v1 = vsub.f32 %v569_v61, %v574_v0  ;;  %v576_v2 = vsub.f32 %v570_v28, %v574_v0 }
 0x29b   : > { %v577_v40 = vmul.f32 %v575_v1, %v575_v1  ;;  %v578_v3 = vmul.f32 %v576_v2, %v576_v2 }
 0x29d   : > { %v579_v6 = vadd.f32 %v578_v3, %v577_v40 }
 0x29f   : > { %580 = vadd.xlane.f32.xlu0 %v579_v6 }
 0x32c   : > { %v581_v7 = vpop.xlane.xlu0 %580 }
 0x32d   : > { %v582_v8 = vmul.f32 0.00390625, %v581_v7 }
 0x32f   : > { %v583_v9 = vadd.f32 1e-05, %v582_v8 }
 0x331   : > { %699 = vrsqrt.f32 %v583_v9 }
 0x33b   : > { %v700_v10 = vpop.eup %699 }
 0x33c   : > { %v585_v58 = vmul.f32 %v700_v10, %v575_v1  ;;  %v586_v11 = vmul.f32 %v700_v10, %v576_v2 }
 0x33e   : > { %v587_v14 = vmax.f32 %v585_v58, 0.0  ;;  %v588_v24 = vmax.f32 %v586_v11, 0.0 }
 0x340   : > { %589 = vst [vmem:[%s197_s26] sm:$0xff] %v587_v14  ;;  %590 = vst [vmem:[%s197_s26 + $0x8] sm:$0xff] %v588_v24 }
 0x341 PF: > { %s14_s15 = sadd.s32 1, %s707_s15  }
 0x342   : > { %p11_p4 = scmp.ge.s32.totalorder %s14_s15, 4  }
 0x344   :  { %13 = sbr.rel (!%p11_p4) target bundleno = 1 (0x1), region = 84 }

</bundles_post_ra>
